<compile_context>
chip_gen: v7x
topology: tpu7x:2x2x1
jax: 0.10.0
libtpu: 0.0.40
codegen_flags: <defaults>
</compile_context>

<pallas_src>
import jax
import jax.numpy as jnp
from jax.experimental import pallas as pl
from jax.experimental.pallas import tpu as pltpu

N_EMBD = 32
DROPOUT = 0.0                     # nn.Dropout -> identity (eval / p = 0)
GELU_C = 0.7978845608028654       # sqrt(2/pi)


# ----------------------------- Pallas kernel --------------------------------
def _mlp_fused_kernel(x_ref, w1_ref, b1_ref, w2_ref, b2_ref, o_ref, acc_ref):
    """One (row-tile, hidden-tile) grid step:
       acc += GELU_tanh(x @ W1[:, k] + b1[k]) @ W2[k, :]; finalize adds b2."""
    k = pl.program_id(1)

    @pl.when(k == 0)
    def _():
        acc_ref[...] = jnp.zeros_like(acc_ref)

    # bf16 x bf16 -> f32 accumulation on the MXU.
    h = jnp.dot(x_ref[...], w1_ref[...], preferred_element_type=jnp.float32)
    h = h + b1_ref[...]                                   # bias + GELU in f32
    h = 0.5 * h * (1.0 + jnp.tanh(GELU_C * (h + 0.044715 * h * h * h)))
    # Second matmul: cast GELU output back to bf16 for the MXU, accumulate in f32.
    acc_ref[...] += jnp.dot(h.astype(w2_ref.dtype), w2_ref[...],
                            preferred_element_type=jnp.float32)

    @pl.when(k == pl.num_programs(1) - 1)
    def _():
        o_ref[...] = (acc_ref[...] + b2_ref[...]).astype(o_ref.dtype)


# ----------------------------- tiling helpers --------------------------------
def _choose_row_tile(n, block_rows):
    """Row tile: multiple of 8 (sublane), capped at cdiv(n, 2) so the grid has >= 2
    steps whenever n > 8 (keeps both v7x TensorCores busy); prefer an exact divisor
    of n so no host-side padding copy is needed."""
    cap = min(block_rows, max(8, pl.cdiv(n, 2)))
    cap = max(8, (cap // 8) * 8)
    for tm in range(cap, 7, -8):
        if n % tm == 0:
            return tm
    return cap  # fallback -> padding path


def _choose_hidden_tile(hdim, block_hidden):
    """Hidden (4C) tile: full when small, otherwise a 128-aligned tile so W1/W2
    tiles and the hidden activation stay bounded in VMEM at production sizes."""
    if hdim <= block_hidden or hdim % block_hidden != 0:
        # TODO(synk): ragged hidden dims (not a multiple of block_hidden) fall back
        # to fully-resident weights; fine for small H, pad/tail-tile for huge H.
        return hdim
    return block_hidden


# ----------------------------- wrapper ---------------------------------------
def mlp_forward(x, w1, b1, w2, b2, *, block_rows=4096, block_hidden=512):
    """Fused MLP forward.

    x: (..., C);  w1: (C, H);  b1: (H,);  w2: (H, C);  b2: (C,)
    Weights are stored [in, out], so x @ w equals PyTorch's x @ weight.T.
    """
    *lead, c = x.shape
    hdim = w1.shape[1]
    out_dtype = x.dtype

    x2 = x.reshape(-1, c)
    n = x2.shape[0]

    # bf16 operands for the MXU; biases stay f32 (added in f32 inside the kernel).
    x_bf = x2.astype(jnp.bfloat16)
    w1_bf = w1.astype(jnp.bfloat16)
    w2_bf = w2.astype(jnp.bfloat16)
    b1_f = b1.astype(jnp.float32).reshape(1, hdim)
    b2_f = b2.astype(jnp.float32).reshape(1, c)

    tm = _choose_row_tile(n, block_rows)
    n_pad = pl.cdiv(n, tm) * tm
    if n_pad != n:  # only when no divisor-friendly tile exists
        x_bf = jnp.pad(x_bf, ((0, n_pad - n), (0, 0)))

    th = _choose_hidden_tile(hdim, block_hidden)
    grid = (n_pad // tm, hdim // th)

    # Scoped-VMEM request from the actual tile footprint (double-buffered ins/outs,
    # f32 accumulator + hidden intermediate), with headroom; floor at the default.
    out_isz = jnp.dtype(out_dtype).itemsize
    per_step = (2 * tm * c * 2          # x tile (bf16, double-buffered)
                + 2 * c * th * 2        # W1 tile
                + 2 * th * 4            # b1 tile (f32)
                + 2 * th * c * 2        # W2 tile
                + 2 * c * 4             # b2 (f32)
                + 2 * tm * c * out_isz  # output tile
                + tm * c * 4            # f32 accumulator scratch
                + tm * th * 4)          # hidden activation intermediate (f32)
    vmem_limit = int(min(64 * 1024 * 1024, max(32 * 1024 * 1024, 2 * per_step)))

    out = pl.pallas_call(
        _mlp_fused_kernel,
        out_shape=jax.ShapeDtypeStruct((n_pad, c), out_dtype),
        grid=grid,
        in_specs=[
            pl.BlockSpec((tm, c), lambda i, k: (i, 0)),    # x row tile (reused over k)
            pl.BlockSpec((c, th), lambda i, k: (0, k)),    # W1 hidden-tile
            pl.BlockSpec((1, th), lambda i, k: (0, k)),    # b1 hidden-tile
            pl.BlockSpec((th, c), lambda i, k: (k, 0)),    # W2 hidden-tile
            pl.BlockSpec((1, c), lambda i, k: (0, 0)),     # b2 (resident)
        ],
        out_specs=pl.BlockSpec((tm, c), lambda i, k: (i, 0)),  # resident across k
        scratch_shapes=[pltpu.VMEM((tm, c), jnp.float32)],     # f32 accumulator
        compiler_params=pltpu.CompilerParams(
            dimension_semantics=("parallel", "arbitrary"),
            vmem_limit_bytes=vmem_limit,
        ),
    )(x_bf, w1_bf, b1_f, w2_bf, b2_f)

    if n_pad != n:
        out = out[:n]
    return out.reshape(*lead, c)


# ----------------------------- pure-JAX reference ----------------------------
def mlp_reference(x, w1, b1, w2, b2):
    h = x @ w1 + b1
    h = 0.5 * h * (1.0 + jnp.tanh(GELU_C * (h + 0.044715 * h * h * h)))
    return h @ w2 + b2


# ----------------------------- parameter init --------------------------------
def init_params(key, c):
    k1, k2, k3, k4 = jax.random.split(key, 4)
    w1 = jax.random.normal(k1, (c, 4 * c), jnp.float32) * 0.02
    b1 = jax.random.normal(k2, (4 * c,), jnp.float32) * 0.02
    w2 = jax.random.normal(k3, (4 * c, c), jnp.float32) * 0.02
    b2 = jax.random.normal(k4, (c,), jnp.float32) * 0.02
    return w1, b1, w2, b2


# ----------------------------- main -------------------------------------------
if __name__ == "__main__":
    key = jax.random.PRNGKey(0)
    kx, kp = jax.random.split(key)

    B, T, C = 2, 16, N_EMBD               # MLP inside a GPT block: x is [B, T, C]
    x = jax.random.normal(kx, (B, T, C), jnp.float32)
    w1, b1, w2, b2 = init_params(kp, C)

    fwd = jax.jit(mlp_forward)
    out = jax.block_until_ready(fwd(x, w1, b1, w2, b2))

    ref = mlp_reference(x, w1, b1, w2, b2)

    assert out.shape == (B, T, C), out.shape
    assert jnp.all(jnp.isfinite(out))
    # bf16 MXU operands with f32 accumulation: tolerance loosened vs. f32 reference.
    max_err = float(jnp.max(jnp.abs(out - ref)))
    assert jnp.allclose(out, ref, rtol=2e-2, atol=2e-3), max_err
    print("KERNEL_OK")
</pallas_src>

<mosaic_0001>
module attributes {stable_mosaic.version = 11 : i64} {
  func.func @_mlp_fused_kernel(%arg0: i32, %arg1: i32, %arg2: memref<16x32xbf16, #tpu.memory_space<vmem>>, %arg3: memref<32x128xbf16, #tpu.memory_space<vmem>>, %arg4: memref<1x128xf32, #tpu.memory_space<vmem>>, %arg5: memref<128x32xbf16, #tpu.memory_space<vmem>>, %arg6: memref<1x32xf32, #tpu.memory_space<vmem>>, %arg7: memref<16x32xf32, #tpu.memory_space<vmem>>, %arg8: memref<16x32xf32, #tpu.memory_space<vmem>>) attributes {dimension_semantics = [#tpu.dimension_semantics<parallel>, #tpu.dimension_semantics<arbitrary>], iteration_bounds = array<i64: 2, 1>, scalar_prefetch = 0 : i64, scratch_operands = 1 : i64, tpu.core_type = #tpu.core_type<tc>, window_params = [{transform_indices = @transform_0, window_bounds = array<i64: 16, 32>}, {transform_indices = @transform_1, window_bounds = array<i64: 32, 128>}, {transform_indices = @transform_2, window_bounds = array<i64: 1, 128>}, {transform_indices = @transform_3, window_bounds = array<i64: 128, 32>}, {pipeline_mode = #tpu.pipeline_mode<synchronous>, transform_indices = @transform_4, window_bounds = array<i64: 1, 32>}, {transform_indices = @transform_5, window_bounds = array<i64: 16, 32>}]} {
    %c0_i32 = arith.constant 0 : i32
    %0 = arith.cmpi eq, %arg1, %c0_i32 : i32
    %1 = arith.extui %0 : i1 to i32
    %c0_i32_0 = arith.constant 0 : i32
    %2 = arith.cmpi ne, %1, %c0_i32_0 : i32
    scf.if %2 {
      %cst_19 = arith.constant 0.000000e+00 : f32
      %31 = vector.broadcast %cst_19 : f32 to vector<16x32xf32>
      %c0_20 = arith.constant 0 : index
      %c0_21 = arith.constant 0 : index
      %32 = vector.load %arg8[%c0_20, %c0_21] : memref<16x32xf32, #tpu.memory_space<vmem>>, vector<16x32xf32>
      tpu.vector_store %arg8[%c0_20, %c0_21], %31 {strides = array<i32>} : memref<16x32xf32, #tpu.memory_space<vmem>>, vector<16x32xf32>,
    } else {
    }
    %c0 = arith.constant 0 : index
    %c0_1 = arith.constant 0 : index
    %3 = vector.load %arg2[%c0, %c0_1] : memref<16x32xbf16, #tpu.memory_space<vmem>>, vector<16x32xbf16>
    %c0_2 = arith.constant 0 : index
    %c0_3 = arith.constant 0 : index
    %4 = vector.load %arg3[%c0_2, %c0_3] : memref<32x128xbf16, #tpu.memory_space<vmem>>, vector<32x128xbf16>
    %cst = arith.constant dense<0.000000e+00> : vector<16x128xf32>
    %5 = tpu.matmul %3, %4, %cst {dimension_numbers = #tpu.dot_dimension_numbers<[1], [0], [0], [1], [0, 0, 1, 1], [], []>} : vector<16x32xbf16>, vector<32x128xbf16>, vector<16x128xf32> -> vector<16x128xf32>
    %c0_4 = arith.constant 0 : index
    %c0_5 = arith.constant 0 : index
    %6 = vector.load %arg4[%c0_4, %c0_5] : memref<1x128xf32, #tpu.memory_space<vmem>>, vector<1x128xf32>
    %7 = vector.broadcast %6 : vector<1x128xf32> to vector<16x128xf32>
    %8 = arith.addf %5, %7 : vector<16x128xf32>
    %cst_6 = arith.constant 5.000000e-01 : f32
    %9 = vector.broadcast %cst_6 : f32 to vector<16x128xf32>
    %10 = arith.mulf %9, %8 : vector<16x128xf32>
    %cst_7 = arith.constant 4.471500e-02 : f32
    %11 = vector.broadcast %cst_7 : f32 to vector<16x128xf32>
    %12 = arith.mulf %11, %8 : vector<16x128xf32>
    %13 = arith.mulf %12, %8 : vector<16x128xf32>
    %14 = arith.mulf %13, %8 : vector<16x128xf32>
    %15 = arith.addf %8, %14 : vector<16x128xf32>
    %cst_8 = arith.constant 0.797884583 : f32
    %16 = vector.broadcast %cst_8 : f32 to vector<16x128xf32>
    %17 = arith.mulf %16, %15 : vector<16x128xf32>
    %18 = math.tanh %17 : vector<16x128xf32>
    %cst_9 = arith.constant 1.000000e+00 : f32
    %19 = vector.broadcast %cst_9 : f32 to vector<16x128xf32>
    %20 = arith.addf %19, %18 : vector<16x128xf32>
    %21 = arith.mulf %10, %20 : vector<16x128xf32>
    %c0_10 = arith.constant 0 : index
    %c0_11 = arith.constant 0 : index
    %22 = vector.load %arg8[%c0_10, %c0_11] : memref<16x32xf32, #tpu.memory_space<vmem>>, vector<16x32xf32>
    %23 = arith.truncf %21 : vector<16x128xf32> to vector<16x128xbf16>
    %c0_12 = arith.constant 0 : index
    %c0_13 = arith.constant 0 : index
    %24 = vector.load %arg5[%c0_12, %c0_13] : memref<128x32xbf16, #tpu.memory_space<vmem>>, vector<128x32xbf16>
    %cst_14 = arith.constant dense<0.000000e+00> : vector<16x32xf32>
    %25 = tpu.matmul %23, %24, %cst_14 {dimension_numbers = #tpu.dot_dimension_numbers<[1], [0], [0], [1], [0, 0, 1, 1], [], []>} : vector<16x128xbf16>, vector<128x32xbf16>, vector<16x32xf32> -> vector<16x32xf32>
    %26 = arith.addf %22, %25 : vector<16x32xf32>
    %c0_15 = arith.constant 0 : index
    %c0_16 = arith.constant 0 : index
    %27 = vector.load %arg8[%c0_15, %c0_16] : memref<16x32xf32, #tpu.memory_space<vmem>>, vector<16x32xf32>
    tpu.vector_store %arg8[%c0_15, %c0_16], %26 {strides = array<i32>} : memref<16x32xf32, #tpu.memory_space<vmem>>, vector<16x32xf32>,
    %c0_i32_17 = arith.constant 0 : i32
    %28 = arith.cmpi eq, %arg1, %c0_i32_17 : i32
    %29 = arith.extui %28 : i1 to i32
    %c0_i32_18 = arith.constant 0 : i32
    %30 = arith.cmpi ne, %29, %c0_i32_18 : i32
    scf.if %30 {
      %c0_19 = arith.constant 0 : index
      %c0_20 = arith.constant 0 : index
      %31 = vector.load %arg8[%c0_19, %c0_20] : memref<16x32xf32, #tpu.memory_space<vmem>>, vector<16x32xf32>
      %c0_21 = arith.constant 0 : index
      %c0_22 = arith.constant 0 : index
      %32 = vector.load %arg6[%c0_21, %c0_22] : memref<1x32xf32, #tpu.memory_space<vmem>>, vector<1x32xf32>
      %33 = vector.broadcast %32 : vector<1x32xf32> to vector<16x32xf32>
      %34 = arith.addf %31, %33 : vector<16x32xf32>
      %c0_23 = arith.constant 0 : index
      %c0_24 = arith.constant 0 : index
      %35 = vector.load %arg7[%c0_23, %c0_24] : memref<16x32xf32, #tpu.memory_space<vmem>>, vector<16x32xf32>
      tpu.vector_store %arg7[%c0_23, %c0_24], %34 {strides = array<i32>} : memref<16x32xf32, #tpu.memory_space<vmem>>, vector<16x32xf32>,
    } else {
    }
    return
  }
  func.func @transform_0(%arg0: i32, %arg1: i32) -> (i32, i32) {
    %c0_i32 = arith.constant 0 : i32
    %c0_i32_0 = arith.constant 0 : i32
    return %arg0, %c0_i32 : i32, i32
  }
  func.func @transform_1(%arg0: i32, %arg1: i32) -> (i32, i32) {
    %c0_i32 = arith.constant 0 : i32
    %c0_i32_0 = arith.constant 0 : i32
    return %c0_i32, %arg1 : i32, i32
  }
  func.func @transform_2(%arg0: i32, %arg1: i32) -> (i32, i32) {
    %c0_i32 = arith.constant 0 : i32
    %c0_i32_0 = arith.constant 0 : i32
    return %c0_i32, %arg1 : i32, i32
  }
  func.func @transform_3(%arg0: i32, %arg1: i32) -> (i32, i32) {
    %c0_i32 = arith.constant 0 : i32
    %c0_i32_0 = arith.constant 0 : i32
    return %arg1, %c0_i32 : i32, i32
  }
  func.func @transform_4(%arg0: i32, %arg1: i32) -> (i32, i32) {
    %c0_i32 = arith.constant 0 : i32
    %c0_i32_0 = arith.constant 0 : i32
    %c0_i32_1 = arith.constant 0 : i32
    return %c0_i32, %c0_i32_0 : i32, i32
  }
  func.func @transform_5(%arg0: i32, %arg1: i32) -> (i32, i32) {
    %c0_i32 = arith.constant 0 : i32
    %c0_i32_0 = arith.constant 0 : i32
    return %arg0, %c0_i32 : i32, i32
  }
}

</mosaic_0001>

<bundles_post_ra>
// kernel: mlp_forward.1
= control target key start
LH: loop header
LB: loop body
LE: loop exit
PB: predicated region body
PF: predicated region fallthrough
CT: control target
= control target key end

     0   :  { %10 = vsyncpa [#allocation4], 0  ;;  %s1063_s0 = inlined_call_operand.vmem [shape: bf16[32,32], index: 0, kind: input, shape index: {}]   ;;  %s1064_s1 = inlined_call_operand.vmem [shape: bf16[32,128], index: 1, kind: input, shape index: {}]   ;;  %s1065_s2 = inlined_call_operand.vmem [shape: f32[1,128], index: 2, kind: input, shape index: {}]   ;;  %s1066_s3 = inlined_call_operand.vmem [shape: bf16[128,32], index: 3, kind: input, shape index: {}]   ;;  %s1067_s4 = inlined_call_operand.vmem [shape: f32[1,32], index: 4, kind: input, shape index: {}]   ;;  %s1068_s5 = inlined_call_operand.hbm [shape: f32[32,32], index: 5, kind: output, shape index: {}]  }
   0x1   :  { %12 = vsyncpa [#allocation4 + $0x1], 0  ;;  %s906_s18 = smov 0   ;;  %s908_s19 = smov 0  }
   0x2   :  { %s910_s20 = smov 0   ;;  %s912_s21 = smov 0  }
   0x3   :  { %s914_s22 = smov 0   ;;  %s916_s23 = smov 0  }
   0x4 LB: > { %s646_s24 = sadd.s32 4294967295, %s869_s23   ;;  %s647_s25 = sadd.s32 4294967294, %s869_s23   ;;  %s869_s23 = sphi %s916_s23, %s18_s23   ;;  %s865_s22 = sphi %s914_s22, %s1075_s22   ;;  %s861_s21 = sphi %s912_s21, %s1074_s21   ;;  %s857_s20 = sphi %s910_s20, %s1073_s20   ;;  %s853_s19 = sphi %s908_s19, %s1072_s19   ;;  %s849_s18 = sphi %s906_s18, %s1071_s18  }
   0x5   : > { %s30_s26 = sadd.s32 1, %s865_s22  ;;  %s162_s27 = sadd.s32 1, %s857_s20 }
   0x6   : > { %p32_p0 = scmp.ge.s32.totalorder %s30_s26, 2  ;;  %p172_p1 = scmp.ne.s32.totalorder %s857_s20, %s853_s19 }
   0x7   : > { %p173_p2 = scmp.eq.s32.totalorder %s646_s24, 1  ;;  %p178_p3 = scmp.ne.s32.totalorder %s853_s19, %s849_s18 }
   0x8   : > { %s1077_s26 = smov (%p32_p0, %s30_s26), 0  ;;  %p179_p5 = scmp.eq.s32.totalorder %s647_s25, 1 }
   0x9   : > { %p946_p4 = por %p173_p2, %p172_p1  ;;  %s159_s29 = ssub.s32 %s865_s22, %s1077_s26 }
   0xa   : > { %p653_p6 = scmp.ge.s32.totalorder %s869_s23, 1  ;;  %p160_p7 = scmp.eq.s32.totalorder %s159_s29, 0 }
   0xb   : > { %p953_p8 = por %p179_p5, %p178_p3  ;;  %p231_p9 = scmp.lt.s32.totalorder %s869_s23, 3 }
   0xc   : > { %s959_s6 = scalar_select %p160_p7, %s857_s20, %s162_s27  }
   0xd   : > { %p232_p10 = pnand %p653_p6, %p231_p9 }
   0xe   : > { %v776_v0 = vld [vmem:[%s1064_s1] sm:$0xff] (!%p232_p10)   ;;  %v871_v1 = vmov (!%p232_p10), 0.0   ;;  %v777_v2 = vld [vmem:[%s1064_s1 + $0x8] sm:$0xff] (!%p232_p10)   ;;  %vm872_vm0 = vmmov (!%p232_p10), 0   ;;  %s655_s11 = sshll.u32 (!%p232_p10), %s861_s21, 1  ;;  %vm296_vm1 = vcmask (!%p232_p10), 261120  }
   0xf   : > { %235 = sbr.rel (%p232_p10) target bundleno = 510 (0x1fe), region = 40  ;;  %689 = vmatprep.subr.bf16.mxu0 (!%p232_p10), %v871_v1  ;;  %697 = vmatprep.subr.bf16.mxu1 (!%p232_p10), %v871_v1  ;;  %p272_p11 = scmp.lt.s32.totalorder (!%p232_p10), %s655_s11, 3  ;;  %297 = vst.msk [vmem:[#allocation2] sm:$0xff] (!%p232_p10), %vm296_vm1, %v871_v1  ;;  %298 = vst.msk [vmem:[#allocation2 + $0x8] sm:$0xff] (!%p232_p10), %vm296_vm1, %v871_v1  ;;  %v779_v4 = vld [vmem:[%s1066_s3] sm:$0xff] (!%p232_p10)   ;;  %v780_v5 = vld [vmem:[%s1066_s3 + $0x8] sm:$0xff] (!%p232_p10)  }
  0x10   : > { %690 = vmatpush3.bf16.msra.mxu0 (!%p232_p10), %v776_v0  ;;  %693 = vmatprep.mubr.msk.bf16.mxu0 (!%p232_p10), %vm872_vm0, %v871_v1  ;;  %v781_v6 = vld [vmem:[%s1066_s3 + $0x10] sm:$0xff] (!%p232_p10)   ;;  %v782_v7 = vld [vmem:[%s1066_s3 + $0x18] sm:$0xff] (!%p232_p10)   ;;  %v783_v8 = vld [vmem:[%s1066_s3 + $0x20] sm:$0xff] (!%p232_p10)   ;;  %s268_s25 = sand.u32 (!%p232_p10), 1, %s853_s19   ;;  %s676_s8 = sshll.u32 (!%p232_p10), %s861_s21, 8 }
  0x11   : > { %691 = vmatprep.subr.bf16.mxu0 (!%p232_p10), %v871_v1  ;;  %713 = vmatprep.mubr.msk.bf16.mxu1 (!%p232_p10), %vm872_vm0, %v871_v1  ;;  %v784_v9 = vld [vmem:[%s1066_s3 + $0x28] sm:$0xff] (!%p232_p10)   ;;  %v785_v10 = vld [vmem:[%s1066_s3 + $0x30] sm:$0xff] (!%p232_p10)   ;;  %v786_v11 = vld [vmem:[%s1066_s3 + $0x38] sm:$0xff] (!%p232_p10)   ;;  %s654_s27 = sshll.u32 (!%p232_p10), %s268_s25, 4  ;;  %s1011_s13 = scalar_lea.hbm (!%p232_p10), %s1068_s5, %s676_s8 }
  0x12   : > { %698 = vmatpush3.bf16.msra.mxu1 (!%p232_p10), %v779_v4  ;;  %v657_v12 = vld [vmem:[%s1065_s2] ss:$0 sm:$0xff] (!%p232_p10)  ;;  %s270_s9 = scalar_lea.vmem (!%p232_p10), [#allocation3], %s654_s27  ;;  %s1017_s21 = scalar_lea.sflag (!%p232_p10), [#allocation4], %s268_s25 }
  0x13   : > { %699 = vmatprep.subr.bf16.mxu1 (!%p232_p10), %v871_v1  ;;  %v670_v46 = vld [vmem:[%s1067_s4] ss:$0 sm:$0xff] (!%p232_p10)  ;;  %s534_s10 = sshll.u32 (!%p232_p10), %s270_s9, 4  ;;  %s1013_s10 = int_to_ptr.vmem [resolvable:$true] %s534_s10 }
  0x14   : > { %692 = vmatpush3.bf16.msra.mxu0 (!%p232_p10), %v777_v2  ;;  %s791_s14 = scalar_lea.vmem (!%p232_p10), %s1013_s10, 256 }
  0x15   : > { %p792_p12 = scmp.ne.s32.totalorder (!%p232_p10), %s1013_s10, %s791_s14 }
  0x16   : > { %s1079_s11 = smov (!%p272_p11, %s655_s11), 3  ;;  %700 = vmatpush3.bf16.msra.mxu1 %v780_v5  ;;  %v392_v38 = vld [vmem:[#allocation2] sm:$0xff]  ;;  %v393_v40 = vld [vmem:[#allocation2 + $0x8] sm:$0xff] }
  0x17   : > { %s656_s12 = sshll.u32 %s1079_s11, 2  ;;  %701 = vmatprep.subr.bf16.mxu1 %v871_v1  ;;  %p793_p13 = pnand %p792_p12, %p946_p4 }
  0x18   : > { %s275_s15 = scalar_lea.vmem %s1063_s0, %s656_s12 }
  0x19   : > { %v778_v3 = vld [vmem:[%s275_s15] sm:$0xff]   ;;  %p794_p0 = pneg %p793_p13  ;;  %s873_s15 = smov [#allocation3]  }
  0x1a   : > { %694 = vmatmul.mubr.msk.bf16.vlgmr.msra.gmra.mrb[0].mxu0 %vm296_vm1, %v778_v3  ;;  %702 = vmatpush3.bf16.msra.mxu1 %v781_v6  ;;  %s795_s16 = sshll.u32 %s873_s15, 4  ;;  %s796_s16 = int_to_ptr.vmem [resolvable:$false] %s795_s16 }
  0x1b   : > { %703 = vmatprep.subr.bf16.mxu1 %v871_v1  ;;  %s797_s17 = scalar_lea.vmem %s796_s16, 512  ;;  %p798_p1 = scmp.lt.s32.totalorder %s1013_s10, %s796_s16 }
  0x1c   : > { %p799_p2 = scmp.lt.s32.totalorder %s797_s17, %s791_s14 }
  0x1e   : > { %704 = vmatpush3.bf16.msra.mxu1 %v782_v7  ;;  %p800_p3 = por %p799_p2, %p798_p1 }
  0x1f   : > { %705 = vmatprep.subr.bf16.mxu1 %v871_v1 }
  0x20   : > { %p801_p5 = pnand %p800_p3, %p794_p0 }
  0x22   : > { %706 = vmatpush3.bf16.msra.mxu1 %v783_v8 }
  0x23   : > { %707 = vmatprep.subr.bf16.mxu1 %v871_v1 }
  0x26   : > { %708 = vmatpush3.bf16.msra.mxu1 %v784_v9 }
  0x27   : > { %709 = vmatprep.subr.bf16.mxu1 %v871_v1 }
  0x2a   : > { %710 = vmatpush3.bf16.msra.mxu1 %v785_v10 }
  0x2b   : > { %711 = vmatprep.subr.bf16.mxu1 %v871_v1 }
  0x2e   : > { %712 = vmatpush3.bf16.msra.mxu1 %v786_v11 }
  0xed   : > { %v367_v13 = vpop.f32.mrb[0].mxu0 }
  0xee   : > { %v368_v14 = vadd.f32 %v657_v12, %v367_v13  ;;  %v695_v15 = vpop.f32.mrb[1].mxu0 }
  0xef   : > { %v370_v16 = vpop.f32.mrb[2].mxu0 }
  0xf0   : > { %v376_v17 = vmul.f32 0.044715, %v368_v14  ;;  %v371_v18 = vadd.f32 %v657_v12, %v370_v16  ;;  %v696_v19 = vpop.f32.mrb[3].mxu0  ;;  %v374_v32 = vmul.f32 0.5, %v368_v14 }
  0xf2   : > { %v378_v20 = vmul.f32 %v376_v17, %v368_v14  ;;  %v377_v21 = vmul.f32 0.044715, %v371_v18  ;;  %v375_v33 = vmul.f32 0.5, %v371_v18 }
  0xf4   : > { %v380_v22 = vmul.f32 %v378_v20, %v368_v14  ;;  %v379_v23 = vmul.f32 %v377_v21, %v371_v18 }
  0xf6   : > { %v381_v24 = vmul.f32 %v379_v23, %v371_v18  ;;  %v382_v25 = vadd.f32 %v380_v22, %v368_v14 }
  0xf8   : > { %v383_v26 = vadd.f32 %v381_v24, %v371_v18  ;;  %v384_v27 = vmul.f32 0.7978846, %v382_v25 }
  0xfa   : > { %v385_v28 = vmul.f32 0.7978846, %v383_v26  ;;  %787 = vtanh.f32 %v384_v27 }
  0xfc   : > { %789 = vtanh.f32 %v385_v28 }
 0x104   : > { %v788_v29 = vpop.eup %787 }
 0x105   : > { %v388_v30 = vadd.f32 1.0, %v788_v29 }
 0x106   : > { %v790_v31 = vpop.eup %789 }
 0x107   : > { %v389_v34 = vadd.f32 1.0, %v790_v31  ;;  %v390_v35 = vmul.f32 %v388_v30, %v374_v32 }
 0x109   : > { %v391_v36 = vmul.f32 %v389_v34, %v375_v33 }
 0x10b   : > { %v394_v37 = vpack.c.bf16 %v391_v36, %v390_v35 }
 0x10d   : > { %714 = vmatmul.mubr.bf16.vlgmr.msra.gmra.mrb[0].mxu1 %v394_v37 }
 0x1e0   : > { %v493_v39 = vpop.f32.mrb[0].mxu1 }
 0x1e1   : > { %v500_v41 = vadd.f32 %v493_v39, %v392_v38  ;;  %v715_v42 = vpop.f32.mrb[1].mxu1 }
 0x1e2   : > { %v496_v43 = vpop.f32.mrb[2].mxu1 }
 0x1e3   : > { %502 = vst.msk [vmem:[#allocation2] sm:$0xff] %vm296_vm1, %v500_v41  ;;  %v501_v44 = vadd.f32 %v496_v43, %v393_v40  ;;  %v716_v45 = vpop.f32.mrb[3].mxu1 }
 0x1e5   : > { %503 = vst.msk [vmem:[#allocation2 + $0x8] sm:$0xff] %vm296_vm1, %v501_v44 }
 0x1ea   : > { %v507_v47 = vld [vmem:[#allocation2] sm:$0xff] }
 0x1eb   : > { %v516_v48 = vadd.f32 %v670_v46, %v507_v47 }
 0x1ec   : > { %v508_v49 = vld [vmem:[#allocation2 + $0x8] sm:$0xff] }
 0x1ed   : > { %v517_v50 = vadd.f32 %v670_v46, %v508_v49  ;;  %518 = vst.msk [vmem:[%s270_s9] sm:$0xff] %vm296_vm1, %v516_v48 }
 0x1ef   : > { %519 = vst.msk [vmem:[%s270_s9 + $0x8] sm:$0xff] %vm296_vm1, %v517_v50 }
 0x1f0   : > { %804 = shalt.err (!%p801_p5)
}
 0x1f1   : > { %s805_s24 = scalar_lea.hbm %s1011_s13, 256  ;;  %s809_s29 = scalar_lea.hbm %s1068_s5, 512 }
 0x1f2   : > { %p806_p6 = scmp.ne.s32.totalorder %s1011_s13, %s805_s24  ;;  %p810_p10 = scmp.lt.u32.totalorder %s1011_s13, %s1068_s5 }
 0x1f3   : > { %p811_p11 = scmp.lt.u32.totalorder %s809_s29, %s805_s24  ;;  %p813_p13 = scmp.lt.u32.totalorder %s805_s24, %s1011_s13 }
 0x1f4   : > { %p807_p7 = pnand %p806_p6, %p946_p4 }
 0x1f5   : > { %p812_p12 = por %p811_p11, %p810_p10 }
 0x1f6   : > { %p808_p9 = pneg %p807_p7 }
 0x1f7   : > { %p814_p0 = por %p813_p13, %p812_p12 }
 0x1f9   : > { %p815_p1 = pnand %p814_p0, %p808_p9 }
 0x1fb   : > { %818 = shalt.err (!%p815_p1)
}
 0x1fc   : > { %s874_s9 = smov 128   ;;  %s875_s11 = smov 8  }
 0x1fd   : > { %717 = dma.vmem_to_hbm [thread:$0]  (%p946_p4), %s1013_s10, 256, %s1011_s13, %s1017_s21, %s874_s9, %s874_s9, %s875_s11  }
 0x1fe PF: > { %p723_p2 = scmp.ge.s32.totalorder %s869_s23, 2  ;;  %s549_s12 = sand.u32 1, %s849_s18  }
 0x1ff   : > { %s550_s14 = scalar_lea.sflag [#allocation4], %s549_s12 }
 0x200   : > { %p720_p3 = pnand %p723_p2, %p953_p8 }
 0x202   : > { %844 = dma.done.wait (!%p720_p3), %s550_s14, 256  }
 0x203   : > { %846 = vsyncadd (!%p720_p3), %s550_s14, 4294967040  ;;  %s18_s23 = sadd.s32 1, %s869_s23   ;;  %s1071_s18 = smov %s853_s19 }
 0x204   : > { %p15_p5 = scmp.ge.s32.totalorder %s18_s23, 4   ;;  %s1072_s19 = smov %s857_s20 }
 0x205   : > { %s1073_s20 = smov %s959_s6  ;;  %s1074_s21 = smov %s865_s22 }
 0x206   : > { %s1075_s22 = smov %s1077_s26  ;;  %17 = sbr.rel (!%p15_p5) target bundleno = 4 (0x4), region = 92 }
 0x20d   :  { %555 = vsyncpa [#allocation4], 1 }
 0x20e   :  { %557 = vsyncpa [#allocation4 + $0x1], 1 }

</bundles_post_ra>
